<compile_context>
chip_gen: v6e
topology: v6e:2x2x1
jax: 0.10.0
libtpu: 0.0.40
codegen_flags: <defaults>
</compile_context>

<pallas_src>
import functools

import jax
import jax.numpy as jnp
from jax.experimental import pallas as pl
from jax.experimental.pallas import tpu as pltpu

_LANE = 128      # lane width (last dim)
_SUBLANE = 8     # f32 sublane width (second-to-last dim)


def _round_up(n: int, m: int) -> int:
    return ((n + m - 1) // m) * m


def _mlp_kernel(x_ref, w1_ref, b1_ref, w2_ref, b2_ref, o_ref):
    # Fused: matmul -> bias -> ReLU -> matmul -> bias, all in VMEM.
    # Matmul inputs may be bf16 (MXU-native on v6e/v7x); accumulation, bias
    # add and ReLU are kept in f32 (no bf16 VPU path on v5e).
    x = x_ref[...]
    h = jnp.dot(x, w1_ref[...], preferred_element_type=jnp.float32)
    h = jnp.maximum(h + b1_ref[...], 0.0)                 # (Bt, Hp) + (1, Hp)
    out = jnp.dot(h.astype(w2_ref.dtype), w2_ref[...],
                  preferred_element_type=jnp.float32)
    out = out + b2_ref[...]                               # (Bt, Cp) + (1, Cp)
    o_ref[...] = out.astype(o_ref.dtype)                  # lane-dense store


@functools.partial(jax.jit, static_argnames=("compute_dtype", "block_b"))
def neural_net_forward(x, w1, b1, w2, b2, *,
                       compute_dtype=jnp.float32, block_b=1024):
    """Fused MLP forward (dropout = identity / eval mode).

    x : (B, input_size)      float32
    w1: (input_size, hidden) float32   (PyTorch linear1.weight.T)
    b1: (1, hidden)          float32
    w2: (hidden, classes)    float32   (PyTorch linear2.weight.T)
    b2: (1, classes)         float32
    returns: (B, classes)    float32
    """
    B, D_in = x.shape
    H = w1.shape[1]
    C = w2.shape[1]

    # --- Pad to MXU / lane-friendly sizes (zero padding is exact: padded
    # input features hit zero weight rows, padded hidden units are ReLU(0)=0
    # and hit zero weight rows of w2, padded classes / batch rows are sliced
    # off below). ---
    D_pad = _round_up(D_in, _LANE)
    H_pad = _round_up(H, _LANE)
    C_pad = _round_up(C, _LANE)

    # Batch tile: multiple of the sublane width, large enough to amortize the
    # per-grid-step overhead, small enough to stay well inside VMEM.
    bt = min(_round_up(B, _SUBLANE), _round_up(block_b, _SUBLANE))
    B_pad = _round_up(B, bt)
    grid_b = B_pad // bt

    cdt = jnp.dtype(compute_dtype)
    x_p = jnp.zeros((B_pad, D_pad), cdt).at[:B, :D_in].set(x.astype(cdt))
    w1_p = jnp.zeros((D_pad, H_pad), cdt).at[:D_in, :H].set(w1.astype(cdt))
    w2_p = jnp.zeros((H_pad, C_pad), cdt).at[:H, :C].set(w2.astype(cdt))
    # Biases stay f32: they are added to the f32 accumulator.
    b1_p = jnp.zeros((1, H_pad), jnp.float32).at[:, :H].set(b1.astype(jnp.float32))
    b2_p = jnp.zeros((1, C_pad), jnp.float32).at[:, :C].set(b2.astype(jnp.float32))

    # --- Right-sized VMEM budget: double-buffered streamed tiles + resident
    # weights (BlockSpec still allocates 2 buffers per operand) + f32 hidden
    # activation, with ~1.5x headroom. ---
    cbytes = cdt.itemsize
    vmem_bytes = 2 * (bt * D_pad * cbytes          # x tile
                      + bt * C_pad * 4             # out tile (f32)
                      + D_pad * H_pad * cbytes     # w1 (resident)
                      + H_pad * C_pad * cbytes     # w2 (resident)
                      + H_pad * 4 + C_pad * 4)     # biases (f32)
    vmem_bytes += bt * H_pad * 4                   # hidden activation
    vmem_limit = int(vmem_bytes * 1.5) + (1 << 20)

    out_padded = pl.pallas_call(
        _mlp_kernel,
        out_shape=jax.ShapeDtypeStruct((B_pad, C_pad), jnp.float32),
        grid=(grid_b,),
        in_specs=[
            # x streams per batch tile.
            pl.BlockSpec((bt, D_pad), lambda i: (i, 0)),
            # Weights/biases: constant block index -> resident in VMEM.
            pl.BlockSpec((D_pad, H_pad), lambda i: (0, 0)),
            pl.BlockSpec((1, H_pad),     lambda i: (0, 0)),
            pl.BlockSpec((H_pad, C_pad), lambda i: (0, 0)),
            pl.BlockSpec((1, C_pad),     lambda i: (0, 0)),
        ],
        out_specs=pl.BlockSpec((bt, C_pad), lambda i: (i, 0)),
        compiler_params=pltpu.CompilerParams(
            dimension_semantics=("parallel",),     # megacore split on v7x
            vmem_limit_bytes=vmem_limit,
        ),
    )(x_p, w1_p, b1_p, w2_p, b2_p)

    # Slice away batch / class padding.
    return out_padded[:B, :C]


def _reference_forward(x, w1, b1, w2, b2):
    h = jnp.maximum(x @ w1 + b1, 0.0)
    return h @ w2 + b2


if __name__ == "__main__":
    # Small shapes consistent with the module's forward:
    # batch=8, input_size=32, hidden_size=32, num_classes=8
    B, D_in, H, C = 8, 32, 32, 8

    key = jax.random.PRNGKey(0)
    kx, kw1, kb1, kw2, kb2 = jax.random.split(key, 5)

    x = jax.random.normal(kx, (B, D_in), dtype=jnp.float32)

    # Deterministic parameter init (matches nn.Linear shapes: weight [out,in]),
    # stored transposed for the kernel's [in, out] layout.
    lim1 = 1.0 / jnp.sqrt(D_in)
    w1 = jax.random.uniform(kw1, (D_in, H), minval=-lim1, maxval=lim1,
                            dtype=jnp.float32)
    b1 = jax.random.uniform(kb1, (1, H), minval=-lim1, maxval=lim1,
                            dtype=jnp.float32)
    lim2 = 1.0 / jnp.sqrt(H)
    w2 = jax.random.uniform(kw2, (H, C), minval=-lim2, maxval=lim2,
                            dtype=jnp.float32)
    b2 = jax.random.uniform(kb2, (1, C), minval=-lim2, maxval=lim2,
                            dtype=jnp.float32)

    ref = _reference_forward(x, w1, b1, w2, b2)

    # f32 compute path (exact-ish): tight tolerance.
    out_f32 = jax.block_until_ready(
        neural_net_forward(x, w1, b1, w2, b2, compute_dtype=jnp.float32))
    assert out_f32.shape == (B, C)
    assert jnp.allclose(out_f32, ref, atol=1e-5, rtol=1e-5), \
        "f32 kernel mismatch vs reference"

    # bf16 MXU path (v6e/v7x-native matmuls, f32 accumulate): loose tolerance.
    out_bf16 = jax.block_until_ready(
        neural_net_forward(x, w1, b1, w2, b2, compute_dtype=jnp.bfloat16))
    assert out_bf16.shape == (B, C)
    assert jnp.allclose(out_bf16, ref, atol=3e-2, rtol=3e-2), \
        "bf16 kernel mismatch vs reference"

    print("KERNEL_OK")
</pallas_src>

<mosaic_0001>
module attributes {stable_mosaic.version = 11 : i64} {
  func.func @_mlp_kernel(%arg0: i32, %arg1: memref<8x128xf32, #tpu.memory_space<vmem>>, %arg2: memref<128x128xf32, #tpu.memory_space<vmem>>, %arg3: memref<1x128xf32, #tpu.memory_space<vmem>>, %arg4: memref<128x128xf32, #tpu.memory_space<vmem>>, %arg5: memref<1x128xf32, #tpu.memory_space<vmem>>, %arg6: memref<8x128xf32, #tpu.memory_space<vmem>>) attributes {dimension_semantics = [#tpu.dimension_semantics<parallel>], iteration_bounds = array<i64: 1>, scalar_prefetch = 0 : i64, scratch_operands = 0 : i64, tpu.core_type = #tpu.core_type<tc>, window_params = [{transform_indices = @transform_0, window_bounds = array<i64: 8, 128>}, {pipeline_mode = #tpu.pipeline_mode<synchronous>, transform_indices = @transform_1, window_bounds = array<i64: 128, 128>}, {pipeline_mode = #tpu.pipeline_mode<synchronous>, transform_indices = @transform_2, window_bounds = array<i64: 1, 128>}, {pipeline_mode = #tpu.pipeline_mode<synchronous>, transform_indices = @transform_3, window_bounds = array<i64: 128, 128>}, {pipeline_mode = #tpu.pipeline_mode<synchronous>, transform_indices = @transform_4, window_bounds = array<i64: 1, 128>}, {transform_indices = @transform_5, window_bounds = array<i64: 8, 128>}]} {
    %c0 = arith.constant 0 : index
    %c0_0 = arith.constant 0 : index
    %0 = vector.load %arg1[%c0, %c0_0] : memref<8x128xf32, #tpu.memory_space<vmem>>, vector<8x128xf32>
    %c0_1 = arith.constant 0 : index
    %c0_2 = arith.constant 0 : index
    %1 = vector.load %arg2[%c0_1, %c0_2] : memref<128x128xf32, #tpu.memory_space<vmem>>, vector<128x128xf32>
    %cst = arith.constant dense<0.000000e+00> : vector<8x128xf32>
    %2 = tpu.matmul %0, %1, %cst {dimension_numbers = #tpu.dot_dimension_numbers<[1], [0], [0], [1], [0, 0, 1, 1], [], []>} : vector<8x128xf32>, vector<128x128xf32>, vector<8x128xf32> -> vector<8x128xf32>
    %c0_3 = arith.constant 0 : index
    %c0_4 = arith.constant 0 : index
    %3 = vector.load %arg3[%c0_3, %c0_4] : memref<1x128xf32, #tpu.memory_space<vmem>>, vector<1x128xf32>
    %4 = vector.broadcast %3 : vector<1x128xf32> to vector<8x128xf32>
    %5 = arith.addf %2, %4 : vector<8x128xf32>
    %cst_5 = arith.constant 0.000000e+00 : f32
    %6 = vector.broadcast %cst_5 : f32 to vector<8x128xf32>
    %7 = arith.maximumf %5, %6 : vector<8x128xf32>
    %c0_6 = arith.constant 0 : index
    %c0_7 = arith.constant 0 : index
    %8 = vector.load %arg4[%c0_6, %c0_7] : memref<128x128xf32, #tpu.memory_space<vmem>>, vector<128x128xf32>
    %cst_8 = arith.constant dense<0.000000e+00> : vector<8x128xf32>
    %9 = tpu.matmul %7, %8, %cst_8 {dimension_numbers = #tpu.dot_dimension_numbers<[1], [0], [0], [1], [0, 0, 1, 1], [], []>} : vector<8x128xf32>, vector<128x128xf32>, vector<8x128xf32> -> vector<8x128xf32>
    %c0_9 = arith.constant 0 : index
    %c0_10 = arith.constant 0 : index
    %10 = vector.load %arg5[%c0_9, %c0_10] : memref<1x128xf32, #tpu.memory_space<vmem>>, vector<1x128xf32>
    %11 = vector.broadcast %10 : vector<1x128xf32> to vector<8x128xf32>
    %12 = arith.addf %9, %11 : vector<8x128xf32>
    %c0_11 = arith.constant 0 : index
    %c0_12 = arith.constant 0 : index
    %13 = vector.load %arg6[%c0_11, %c0_12] : memref<8x128xf32, #tpu.memory_space<vmem>>, vector<8x128xf32>
    tpu.vector_store %arg6[%c0_11, %c0_12], %12 {strides = array<i32>} : memref<8x128xf32, #tpu.memory_space<vmem>>, vector<8x128xf32>,
    return
  }
  func.func @transform_0(%arg0: i32) -> (i32, i32) {
    %c0_i32 = arith.constant 0 : i32
    %c0_i32_0 = arith.constant 0 : i32
    return %arg0, %c0_i32 : i32, i32
  }
  func.func @transform_1(%arg0: i32) -> (i32, i32) {
    %c0_i32 = arith.constant 0 : i32
    %c0_i32_0 = arith.constant 0 : i32
    %c0_i32_1 = arith.constant 0 : i32
    return %c0_i32, %c0_i32_0 : i32, i32
  }
  func.func @transform_2(%arg0: i32) -> (i32, i32) {
    %c0_i32 = arith.constant 0 : i32
    %c0_i32_0 = arith.constant 0 : i32
    %c0_i32_1 = arith.constant 0 : i32
    return %c0_i32, %c0_i32_0 : i32, i32
  }
  func.func @transform_3(%arg0: i32) -> (i32, i32) {
    %c0_i32 = arith.constant 0 : i32
    %c0_i32_0 = arith.constant 0 : i32
    %c0_i32_1 = arith.constant 0 : i32
    return %c0_i32, %c0_i32_0 : i32, i32
  }
  func.func @transform_4(%arg0: i32) -> (i32, i32) {
    %c0_i32 = arith.constant 0 : i32
    %c0_i32_0 = arith.constant 0 : i32
    %c0_i32_1 = arith.constant 0 : i32
    return %c0_i32, %c0_i32_0 : i32, i32
  }
  func.func @transform_5(%arg0: i32) -> (i32, i32) {
    %c0_i32 = arith.constant 0 : i32
    %c0_i32_0 = arith.constant 0 : i32
    return %arg0, %c0_i32 : i32, i32
  }
}

</mosaic_0001>

<bundles_post_ra>
// kernel: neural_net_forward.1
= control target key start
LH: loop header
LB: loop body
LE: loop exit
PB: predicated region body
PF: predicated region fallthrough
CT: control target
= control target key end

     0   :  { %v355_v1 = vmov 0.0   ;;  %vm356_vm0 = vmmov 0   ;;  %s530_s0 = inlined_call_operand.vmem [shape: f32[8,128], index: 0, kind: input, shape index: {}]   ;;  %s531_s1 = inlined_call_operand.vmem [shape: f32[128,128], index: 1, kind: input, shape index: {}]   ;;  %s532_s2 = inlined_call_operand.vmem [shape: f32[1,128], index: 2, kind: input, shape index: {}]   ;;  %s533_s3 = inlined_call_operand.vmem [shape: f32[128,128], index: 3, kind: input, shape index: {}]   ;;  %s534_s4 = inlined_call_operand.vmem [shape: f32[1,128], index: 4, kind: input, shape index: {}]   ;;  %s535_s5 = inlined_call_operand.hbm [shape: f32[8,128], index: 5, kind: output, shape index: {}]  }
   0x1   :  { %v37_v0 = vld [vmem:[%s531_s1 + $0x78] sm:$0xff]  ;;  %260 = vmatprep.subr.mxu0 %v355_v1  ;;  %v36_v2 = vld [vmem:[%s531_s1 + $0x70] sm:$0xff]  ;;  %292 = vmatprep.mubr.msk.f32.mxu0 %vm356_vm0, %v355_v1  ;;  %v35_v3 = vld [vmem:[%s531_s1 + $0x68] sm:$0xff] }
   0x2   :  { %261 = vmatpush3.msra.mxu0 %v37_v0  ;;  %295 = vmatprep.subr.mxu1 %v355_v1  ;;  %v34_v4 = vld [vmem:[%s531_s1 + $0x60] sm:$0xff]  ;;  %v131_v5 = vld [vmem:[%s533_s3 + $0x78] sm:$0xff]  ;;  %v130_v6 = vld [vmem:[%s533_s3 + $0x70] sm:$0xff] }
   0x3   :  { %262 = vmatprep.subr.mxu0 %v355_v1  ;;  %327 = vmatprep.mubr.msk.f32.mxu1 %vm356_vm0, %v355_v1  ;;  %v33_v7 = vld [vmem:[%s531_s1 + $0x58] sm:$0xff]  ;;  %v129_v8 = vld [vmem:[%s533_s3 + $0x68] sm:$0xff]  ;;  %v32_v9 = vld [vmem:[%s531_s1 + $0x50] sm:$0xff] }
   0x4   :  { %263 = vmatpush3.msra.mxu0 %v36_v2  ;;  %296 = vmatpush3.msra.mxu1 %v131_v5  ;;  %v128_v10 = vld [vmem:[%s533_s3 + $0x60] sm:$0xff] }
   0x5   :  { %264 = vmatprep.subr.mxu0 %v355_v1  ;;  %297 = vmatprep.subr.mxu1 %v355_v1 }
   0x6   :  { %265 = vmatpush3.msra.mxu0 %v35_v3  ;;  %298 = vmatpush3.msra.mxu1 %v130_v6 }
   0x7   :  { %266 = vmatprep.subr.mxu0 %v355_v1  ;;  %299 = vmatprep.subr.mxu1 %v355_v1 }
   0x8   :  { %267 = vmatpush3.msra.mxu0 %v34_v4  ;;  %300 = vmatpush3.msra.mxu1 %v129_v8 }
   0x9   :  { %268 = vmatprep.subr.mxu0 %v355_v1 }
   0xa   :  { %269 = vmatpush3.msra.mxu0 %v33_v7 }
   0xb   :  { %10 = vsyncpa [#allocation3], 0  ;;  %270 = vmatprep.subr.mxu0 %v355_v1  ;;  %v31_v11 = vld [vmem:[%s531_s1 + $0x48] sm:$0xff]  ;;  %301 = vmatprep.subr.mxu1 %v355_v1  ;;  %v127_v12 = vld [vmem:[%s533_s3 + $0x58] sm:$0xff]  ;;  %s357_s11 = smov [#allocation2]  }
   0xc   :  { %271 = vmatpush3.msra.mxu0 %v32_v9  ;;  %302 = vmatpush3.msra.mxu1 %v128_v10  ;;  %v30_v13 = vld [vmem:[%s531_s1 + $0x40] sm:$0xff]  ;;  %v126_v14 = vld [vmem:[%s533_s3 + $0x50] sm:$0xff]  ;;  %v29_v15 = vld [vmem:[%s531_s1 + $0x38] sm:$0xff]  ;;  %s216_s12 = sshll.u32 %s357_s11, 4  ;;  %s217_s12 = int_to_ptr.vmem [resolvable:$true] %s216_s12 }
   0xd   :  { %272 = vmatprep.subr.mxu0 %v355_v1  ;;  %303 = vmatprep.subr.mxu1 %v355_v1  ;;  %v125_v16 = vld [vmem:[%s533_s3 + $0x48] sm:$0xff]  ;;  %v28_v17 = vld [vmem:[%s531_s1 + $0x30] sm:$0xff]  ;;  %v124_v18 = vld [vmem:[%s533_s3 + $0x40] sm:$0xff]  ;;  %p338_p1 = scmp.lt.s32.totalorder %s217_s12, %s217_s12 }
   0xe   :  { %273 = vmatpush3.msra.mxu0 %v31_v11  ;;  %304 = vmatpush3.msra.mxu1 %v127_v12  ;;  %v27_v19 = vld [vmem:[%s531_s1 + $0x28] sm:$0xff]  ;;  %v123_v20 = vld [vmem:[%s533_s3 + $0x38] sm:$0xff]  ;;  %v26_v21 = vld [vmem:[%s531_s1 + $0x20] sm:$0xff] }
   0xf   :  { %274 = vmatprep.subr.mxu0 %v355_v1  ;;  %305 = vmatprep.subr.mxu1 %v355_v1  ;;  %v122_v22 = vld [vmem:[%s533_s3 + $0x30] sm:$0xff]  ;;  %v25_v23 = vld [vmem:[%s531_s1 + $0x18] sm:$0xff]  ;;  %v121_v24 = vld [vmem:[%s533_s3 + $0x28] sm:$0xff] }
  0x10   :  { %275 = vmatpush3.msra.mxu0 %v30_v13  ;;  %306 = vmatpush3.msra.mxu1 %v126_v14  ;;  %v24_v25 = vld [vmem:[%s531_s1 + $0x10] sm:$0xff]  ;;  %v120_v26 = vld [vmem:[%s533_s3 + $0x20] sm:$0xff]  ;;  %v23_v27 = vld [vmem:[%s531_s1 + $0x8] sm:$0xff] }
  0x11   :  { %276 = vmatprep.subr.mxu0 %v355_v1  ;;  %307 = vmatprep.subr.mxu1 %v355_v1  ;;  %v119_v28 = vld [vmem:[%s533_s3 + $0x18] sm:$0xff]  ;;  %v22_v29 = vld [vmem:[%s531_s1] sm:$0xff]  ;;  %v118_v31 = vld [vmem:[%s533_s3 + $0x10] sm:$0xff] }
  0x12   :  { %277 = vmatpush3.msra.mxu0 %v29_v15  ;;  %308 = vmatpush3.msra.mxu1 %v125_v16  ;;  %v21_v30 = vld [vmem:[%s530_s0] sm:$0xff]  ;;  %v117_v32 = vld [vmem:[%s533_s3 + $0x8] sm:$0xff] }
  0x13   :  { %278 = vmatprep.subr.mxu0 %v355_v1  ;;  %309 = vmatprep.subr.mxu1 %v355_v1  ;;  %v116_v33 = vld [vmem:[%s533_s3] sm:$0xff]  ;;  %s333_s3 = scalar_lea.vmem %s217_s12, 128 }
  0x14   :  { %279 = vmatpush3.msra.mxu0 %v28_v17  ;;  %310 = vmatpush3.msra.mxu1 %v124_v18  ;;  %v224_v34 = vld [vmem:[%s532_s2] ss:$0 sm:$0xff]  ;;  %p334_p0 = scmp.ne.s32.totalorder %s217_s12, %s333_s3  ;;  %p339_p2 = scmp.lt.s32.totalorder %s333_s3, %s333_s3 }
  0x15   :  { %280 = vmatprep.subr.mxu0 %v355_v1  ;;  %311 = vmatprep.subr.mxu1 %v355_v1  ;;  %v225_v39 = vld [vmem:[%s534_s4] ss:$0 sm:$0xff] }
  0x16   :  { %281 = vmatpush3.msra.mxu0 %v27_v19  ;;  %312 = vmatpush3.msra.mxu1 %v123_v20  ;;  %p340_p3 = por %p339_p2, %p338_p1 }
  0x17   :  { %282 = vmatprep.subr.mxu0 %v355_v1  ;;  %313 = vmatprep.subr.mxu1 %v355_v1 }
  0x18   :  { %283 = vmatpush3.msra.mxu0 %v26_v21  ;;  %314 = vmatpush3.msra.mxu1 %v122_v22  ;;  %p341_p4 = pnand %p340_p3, %p334_p0 }
  0x19   :  { %284 = vmatprep.subr.mxu0 %v355_v1  ;;  %315 = vmatprep.subr.mxu1 %v355_v1 }
  0x1a   :  { %285 = vmatpush3.msra.mxu0 %v25_v23  ;;  %316 = vmatpush3.msra.mxu1 %v121_v24 }
  0x1b   :  { %286 = vmatprep.subr.mxu0 %v355_v1  ;;  %317 = vmatprep.subr.mxu1 %v355_v1 }
  0x1c   :  { %287 = vmatpush3.msra.mxu0 %v24_v25  ;;  %318 = vmatpush3.msra.mxu1 %v120_v26 }
  0x1d   :  { %288 = vmatprep.subr.mxu0 %v355_v1  ;;  %319 = vmatprep.subr.mxu1 %v355_v1 }
  0x1e   :  { %289 = vmatpush3.msra.mxu0 %v23_v27  ;;  %320 = vmatpush3.msra.mxu1 %v119_v28 }
  0x1f   :  { %290 = vmatprep.subr.mxu0 %v355_v1  ;;  %321 = vmatprep.subr.mxu1 %v355_v1 }
  0x20   :  { %291 = vmatpush3.msra.mxu0 %v22_v29  ;;  %322 = vmatpush3.msra.mxu1 %v118_v31 }
  0x21   :  { %293 = vmatmul.mubr.f32.vlgmr.msra.gmra.mxu0 %v21_v30  ;;  %323 = vmatprep.subr.mxu1 %v355_v1 }
  0x22   :  { %324 = vmatpush3.msra.mxu1 %v117_v32 }
  0x23   :  { %325 = vmatprep.subr.mxu1 %v355_v1 }
  0x24   :  { %326 = vmatpush3.msra.mxu1 %v116_v33 }
  0xe1   :  { %v111_v35 = vpop.f32.mrf.mxu0 }
  0xe2   :  { %v112_v36 = vadd.f32 %v224_v34, %v111_v35 }
  0xe3   :  { %v294_v37 = vpop.f32.mrf.mxu0 }
  0xe4   :  { %v115_v38 = vmax.f32 %v112_v36, 0.0 }
  0xe6   :  { %328 = vmatmul.mubr.f32.vlgmr.msra.gmra.mxu1 %v115_v38 }
 0x1a6   :  { %v205_v40 = vpop.f32.mrf.mxu1 }
 0x1a7   :  { %v206_v41 = vadd.f32 %v225_v39, %v205_v40 }
 0x1a8   :  { %v329_v42 = vpop.f32.mrf.mxu1 }
 0x1a9   :  { %209 = vst [vmem:[#allocation2] sm:$0xff] %v206_v41 }
 0x1aa   :  { %344 = shalt.err (!%p341_p4)
}
 0x1ab   :  { %219 = dma.vmem_to_hbm [thread:$0]  %s217_s12, 128, %s535_s5, [#allocation3]  }
 0x1ac   :  { %353 = dma.done.wait [#allocation3], 128  }
 0x1ad   :  { %354 = vsyncadd [#allocation3], 4294967168 }
 0x1ae   :  { %223 = vsyncpa [#allocation3], 1 }

</bundles_post_ra>
